<compile_context>
chip_gen: v5e
topology: v5e:2x2
jax: 0.10.0
libtpu: 0.0.40
codegen_flags: <defaults>
</compile_context>

<pallas_src>
import functools
import math

import jax
import jax.numpy as jnp
from jax.experimental import pallas as pl
from jax.experimental.pallas import tpu as pltpu


def _round_up(x, m):
    return (x + m - 1) // m * m


def _sum_agg_kernel(m_ref, o_ref, acc_ref, *, kblk, k_true, mask_k):
    k = pl.program_id(1)

    @pl.when(k == 0)
    def _():
        acc_ref[...] = jnp.zeros_like(acc_ref)

    data = m_ref[...].astype(acc_ref.dtype)              # (kblk, tl)
    if mask_k:
        # Last K block extends past the true K: zero the out-of-range rows
        # (their VMEM contents are unspecified).
        row = jax.lax.broadcasted_iota(jnp.int32, data.shape, 0) + k * kblk
        data = jnp.where(row < k_true, data, 0)

    # Fold the K chunk onto 8 sublanes with plain vector adds; keep the
    # accumulator sublane-dense.  No cross-sublane (XLU) work in the hot loop.
    acc_ref[...] += jnp.sum(data.reshape(kblk // 8, 8, -1), axis=0)

    @pl.when(k == pl.num_programs(1) - 1)
    def _():
        # Single deferred 8->1 cross-sublane reduce + dtype cast per out tile.
        o_ref[...] = jnp.sum(acc_ref[...], axis=0, keepdims=True).astype(o_ref.dtype)


def message_sum_agg(M: jax.Array, *, target_step_bytes: int = 8 << 20,
                    max_lane_tile: int = 16384) -> jax.Array:
    """Sum over axis 0 of M, equivalent to torch.sum(M, 0)."""
    K = M.shape[0]
    out_shape = M.shape[1:]
    L = int(math.prod(out_shape)) if out_shape else 1
    out_dtype = M.dtype
    # TODO(synk): torch.sum promotes sub-int64 integer inputs to int64; we keep
    # the input dtype (int32 accumulation) to stay TPU/x32-friendly.

    if K == 0 or L == 0:
        return jnp.zeros(out_shape, dtype=out_dtype)

    # Flatten trailing dims into one lane-dense axis (no data movement).
    M2 = M.reshape(K, L)

    itemsize = jnp.dtype(M.dtype).itemsize
    pack = max(1, 4 // itemsize)          # sublane packing: f32->1, bf16->2, i8->4
    sub = 8 * pack                        # minimum K granularity (one packed sublane group)

    # ---- lane tiling: balanced tiles; >=2 tiles when possible so the
    # "parallel" axis actually splits across v7x's two TensorCores.
    n_lt = max(1, pl.cdiv(L, max_lane_tile))
    if n_lt < 2 and L >= 256:
        n_lt = 2
    if n_lt == 1:
        tl = L                            # full-extent block: always legal
    else:
        tl = _round_up(pl.cdiv(L, n_lt), 128)
        n_lt = pl.cdiv(L, tl)

    # ---- K tiling: ~target_step_bytes of input per grid step, capped so the
    # double-buffered input blocks stay well inside this chip's VMEM.
    try:
        vmem_cap = int(getattr(pltpu.get_tpu_info(), "vmem_capacity_bytes"))
    except Exception:
        vmem_cap = 64 << 20               # v7x-safe fallback
    vmem_limit = min((vmem_cap * 3) // 4, 96 << 20)
    input_budget = vmem_limit // 2        # for the 2x double-buffered input block

    bytes_per_row = tl * itemsize
    kblk = max(sub, (target_step_bytes // bytes_per_row) // sub * sub)
    kblk_cap = max(sub, (input_budget // (2 * bytes_per_row)) // sub * sub)
    kblk = min(kblk, kblk_cap, _round_up(K, sub))
    n_kb = pl.cdiv(K, kblk)
    mask_k = (K % kblk) != 0              # last K block has out-of-range rows

    acc_dtype = jnp.float32 if jnp.issubdtype(M.dtype, jnp.floating) else jnp.int32
    kernel = functools.partial(_sum_agg_kernel, kblk=kblk, k_true=K, mask_k=mask_k)

    out2 = pl.pallas_call(
        kernel,
        out_shape=jax.ShapeDtypeStruct((1, L), out_dtype),
        grid_spec=pltpu.PrefetchScalarGridSpec(
            num_scalar_prefetch=0,
            grid=(n_lt, n_kb),            # (parallel lane tiles, K reduction last)
            in_specs=[pl.BlockSpec((kblk, tl), lambda i, k: (k, i))],
            # Same output tile across the K axis (resident target); written
            # only on the last K step.
            out_specs=pl.BlockSpec((1, tl), lambda i, k: (0, i)),
            scratch_shapes=[pltpu.VMEM((8, tl), acc_dtype)],
        ),
        compiler_params=pltpu.CompilerParams(
            dimension_semantics=("parallel", "arbitrary"),
            vmem_limit_bytes=int(vmem_limit),
        ),
    )(M2)

    return out2[0].reshape(out_shape)


if __name__ == "__main__":
    key = jax.random.PRNGKey(0)

    # 1) Aligned shapes: K=8 messages, N=16 nodes, D=32 features (2 lane tiles).
    K, N, D = 8, 16, 32
    M = jax.random.normal(key, (K, N, D), dtype=jnp.float32)
    out = jax.block_until_ready(message_sum_agg(M))
    ref = jnp.sum(M, axis=0)
    assert out.shape == ref.shape and out.dtype == ref.dtype
    assert jnp.allclose(out, ref, atol=1e-5, rtol=1e-5)

    # 2) Non-aligned K and L: exercises in-kernel K masking + partial blocks.
    M2 = jax.random.normal(jax.random.PRNGKey(1), (13, 7, 33), dtype=jnp.float32)
    out2 = jax.block_until_ready(message_sum_agg(M2))
    ref2 = jnp.sum(M2, axis=0)
    assert out2.shape == ref2.shape and out2.dtype == ref2.dtype
    assert jnp.allclose(out2, ref2, atol=1e-5, rtol=1e-5)

    # 3) bf16 input: wide (f32) accumulation, cast on the final step.
    M3 = jax.random.normal(jax.random.PRNGKey(2), (10, 24, 40), dtype=jnp.bfloat16)
    out3 = jax.block_until_ready(message_sum_agg(M3))
    ref3 = jnp.sum(M3.astype(jnp.float32), axis=0)
    assert out3.shape == ref3.shape and out3.dtype == M3.dtype
    assert jnp.allclose(out3.astype(jnp.float32), ref3, atol=5e-2, rtol=1e-2)

    print("KERNEL_OK")
</pallas_src>

<mosaic_0001>
module attributes {stable_mosaic.version = 11 : i64} {
  func.func @_sum_agg_kernel(%arg0: i32, %arg1: i32, %arg2: memref<8x256xf32, #tpu.memory_space<vmem>>, %arg3: memref<1x256xf32, #tpu.memory_space<vmem>>, %arg4: memref<8x256xf32, #tpu.memory_space<vmem>>) attributes {dimension_semantics = [#tpu.dimension_semantics<parallel>, #tpu.dimension_semantics<arbitrary>], iteration_bounds = array<i64: 2, 1>, scalar_prefetch = 0 : i64, scratch_operands = 1 : i64, tpu.core_type = #tpu.core_type<tc>, window_params = [{transform_indices = @transform_0, window_bounds = array<i64: 8, 256>}, {transform_indices = @transform_1, window_bounds = array<i64: 1, 256>}]} {
    %c0_i32 = arith.constant 0 : i32
    %0 = arith.cmpi eq, %arg1, %c0_i32 : i32
    %1 = arith.extui %0 : i1 to i32
    %c0_i32_0 = arith.constant 0 : i32
    %2 = arith.cmpi ne, %1, %c0_i32_0 : i32
    scf.if %2 {
      %cst_8 = arith.constant 0.000000e+00 : f32
      %12 = vector.broadcast %cst_8 : f32 to vector<8x256xf32>
      %c0_9 = arith.constant 0 : index
      %c0_10 = arith.constant 0 : index
      %13 = vector.load %arg4[%c0_9, %c0_10] : memref<8x256xf32, #tpu.memory_space<vmem>>, vector<8x256xf32>
      tpu.vector_store %arg4[%c0_9, %c0_10], %12 {strides = array<i32>} : memref<8x256xf32, #tpu.memory_space<vmem>>, vector<8x256xf32>,
    } else {
    }
    %c0 = arith.constant 0 : index
    %c0_1 = arith.constant 0 : index
    %3 = vector.load %arg2[%c0, %c0_1] : memref<8x256xf32, #tpu.memory_space<vmem>>, vector<8x256xf32>
    %c0_2 = arith.constant 0 : index
    %c0_3 = arith.constant 0 : index
    %4 = vector.load %arg4[%c0_2, %c0_3] : memref<8x256xf32, #tpu.memory_space<vmem>>, vector<8x256xf32>
    %5 = vector.shape_cast %3 : vector<8x256xf32> to vector<1x8x256xf32>
    %cst = arith.constant dense<0.000000e+00> : vector<8x256xf32>
    %6 = vector.multi_reduction <add>, %5, %cst [0] : vector<1x8x256xf32> to vector<8x256xf32>
    %7 = arith.addf %4, %6 : vector<8x256xf32>
    %c0_4 = arith.constant 0 : index
    %c0_5 = arith.constant 0 : index
    %8 = vector.load %arg4[%c0_4, %c0_5] : memref<8x256xf32, #tpu.memory_space<vmem>>, vector<8x256xf32>
    tpu.vector_store %arg4[%c0_4, %c0_5], %7 {strides = array<i32>} : memref<8x256xf32, #tpu.memory_space<vmem>>, vector<8x256xf32>,
    %c0_i32_6 = arith.constant 0 : i32
    %9 = arith.cmpi eq, %arg1, %c0_i32_6 : i32
    %10 = arith.extui %9 : i1 to i32
    %c0_i32_7 = arith.constant 0 : i32
    %11 = arith.cmpi ne, %10, %c0_i32_7 : i32
    scf.if %11 {
      %c0_8 = arith.constant 0 : index
      %c0_9 = arith.constant 0 : index
      %12 = vector.load %arg4[%c0_8, %c0_9] : memref<8x256xf32, #tpu.memory_space<vmem>>, vector<8x256xf32>
      %cst_10 = arith.constant dense<0.000000e+00> : vector<256xf32>
      %13 = vector.multi_reduction <add>, %12, %cst_10 [0] : vector<8x256xf32> to vector<256xf32>
      %14 = vector.shape_cast %13 : vector<256xf32> to vector<1x256xf32>
      %c0_11 = arith.constant 0 : index
      %c0_12 = arith.constant 0 : index
      %15 = vector.load %arg3[%c0_11, %c0_12] : memref<1x256xf32, #tpu.memory_space<vmem>>, vector<1x256xf32>
      tpu.vector_store %arg3[%c0_11, %c0_12], %14 {strides = array<i32>} : memref<1x256xf32, #tpu.memory_space<vmem>>, vector<1x256xf32>,
    } else {
    }
    return
  }
  func.func @transform_0(%arg0: i32, %arg1: i32) -> (i32, i32) {
    %c0_i32 = arith.constant 0 : i32
    return %arg1, %arg0 : i32, i32
  }
  func.func @transform_1(%arg0: i32, %arg1: i32) -> (i32, i32) {
    %c0_i32 = arith.constant 0 : i32
    %c0_i32_0 = arith.constant 0 : i32
    return %c0_i32, %arg0 : i32, i32
  }
}

</mosaic_0001>

<bundles_post_ra>
// kernel: tpu_custom_call.1
= control target key start
LH: loop header
LB: loop body
LE: loop exit
PB: predicated region body
PF: predicated region fallthrough
CT: control target
= control target key end

     0   :  { %6 = vsyncpa [#allocation4], 0  ;;  %s616_s0 = inlined_call_operand.hbm [shape: f32[8,512], index: 0, kind: input, shape index: {}]   ;;  %s617_s1 = inlined_call_operand.hbm [shape: f32[1,512], index: 1, kind: output, shape index: {}]  }
   0x1   :  { %8 = vsyncpa [#allocation4 + $0x1], 0 }
   0x2   :  { %9 = vsyncpa [#allocation5], 0 }
   0x3   :  { %11 = vsyncpa [#allocation5 + $0x1], 0  ;;  %s495_s6 = smov 0   ;;  %s497_s7 = smov 0  }
   0x4   :  { %s499_s8 = smov 0   ;;  %s501_s9 = smov 0  }
   0x5   :  { %s503_s10 = smov 0   ;;  %s505_s11 = smov 0  }
   0x6 LB: > { %s294_s12 = sadd.s32 4294967295, %s483_s11   ;;  %s295_s13 = sadd.s32 4294967294, %s483_s11   ;;  %s483_s11 = sphi %s505_s11, %s17_s11   ;;  %s479_s10 = sphi %s503_s10, %s626_s10   ;;  %s475_s9 = sphi %s501_s9, %s625_s9   ;;  %s471_s8 = sphi %s499_s8, %s624_s8   ;;  %s467_s7 = sphi %s497_s7, %s623_s7   ;;  %s463_s6 = sphi %s495_s6, %s622_s6  }
   0x7   : > { %s29_s14 = sadd.s32 1, %s479_s10  ;;  %s38_s15 = sadd.s32 1, %s471_s8 }
   0x8   : > { %p31_p0 = scmp.ge.s32.totalorder %s29_s14, 2  ;;  %p45_p1 = scmp.ne.s32.totalorder %s471_s8, %s467_s7 }
   0x9   : > { %p46_p2 = scmp.eq.s32.totalorder %s483_s11, 0  ;;  %p51_p3 = scmp.ne.s32.totalorder %s467_s7, %s463_s6 }
   0xa   : > { %s628_s14 = smov (%p31_p0, %s29_s14), 0  ;;  %p52_p5 = scmp.eq.s32.totalorder %s294_s12, 0 }
   0xb   : > { %p536_p4 = por %p46_p2, %p45_p1  ;;  %s34_s17 = ssub.s32 %s479_s10, %s628_s14 }
   0xc   : > { %p75_p6 = scmp.eq.s32.totalorder %s294_s12, 1  ;;  %p36_p7 = scmp.eq.s32.totalorder %s34_s17, 0 }
   0xd   : > { %p542_p8 = por %p52_p5, %p51_p3  ;;  %p81_p10 = scmp.eq.s32.totalorder %s295_s13, 1 }
   0xe   : > { %p546_p9 = por %p75_p6, %p45_p1  ;;  %p297_p12 = scmp.ge.s32.totalorder %s483_s11, 2 }
   0xf   : > { %s551_s20 = scalar_select %p36_p7, %s471_s8, %s38_s15  }
  0x10   : > { %p553_p11 = por %p81_p10, %p51_p3  ;;  %p321_p13 = scmp.lt.s32.totalorder %s483_s11, 2 }
  0x11   : > { %s101_s22 = sand.u32 1, %s471_s8   ;;  %s308_s24 = sshll.u32 %s479_s10, 4 }
  0x12   : > { %s298_s23 = sshll.u32 %s101_s22, 4  ;;  %s112_s27 = scalar_lea.hbm %s616_s0, %s308_s24 }
  0x13   : > { %s105_s28 = scalar_lea.vmem [#allocation3], %s298_s23  ;;  %s114_s30 = sshll.u32 %s112_s27, 4  ;;  %s115_s30 = int_to_ptr.hbm [resolvable:$true] %s114_s30 }
  0x14   : > { %s116_s29 = sshll.u32 %s105_s28, 4  ;;  %p314_p0 = pnand %p321_p13, %p536_p4  ;;  %s117_s29 = int_to_ptr.vmem [resolvable:$true] %s116_s29 }
  0x15   : > { %p301_p1 = scmp.ge.s32.totalorder %s483_s11, 1  ;;  %p121_p2 = scmp.lt.s32.totalorder %s483_s11, 3 }
  0x16   : > { %s102_s2 = scalar_lea.sflag [#allocation4], %s101_s22 }
  0x17   : > { %316 = dma.hbm_to_vmem [thread:$0]  (!%p314_p0), %s115_s30, 256, %s117_s29, %s102_s2  }
  0x18   : > { %p122_p3 = pnand %p301_p1, %p121_p2 }
  0x19   : > { %s569_s3 = sand.u32 (!%p122_p3), 1, %s467_s7  }
  0x1a   : > { %125 = sbr.rel (%p122_p3) target bundleno = 51 (0x33), region = 24  ;;  %s302_s4 = sshll.u32 (!%p122_p3), %s569_s3, 4 }
  0x1b   : > { %s128_s5 = scalar_lea.sflag (!%p122_p3), [#allocation4], %s569_s3  ;;  %s131_s12 = scalar_lea.vmem (!%p122_p3), [#allocation3], %s302_s4 }
  0x1f   : > { %454 = dma.done.wait (%p542_p8), %s128_s5, 256  }
  0x20   : > { %456 = vsyncadd (%p542_p8), %s128_s5, 4294967040  ;;  %v159_v0 = vld [vmem:[%s131_s12] sm:$0xff]  ;;  %v160_v1 = vld [vmem:[%s131_s12 + $0x8] sm:$0xff]  ;;  %s303_s13 = sshll.u32 %s569_s3, 1  ;;  %s305_s15 = sshll.u32 %s475_s9, 1  ;;  %v192_v12 = vlaneseq  ;;  %vm189_vm0 = vcmask 1040384  }
  0x21   : > { %v174_v2 = vrot.slane %v159_v0, 4  ;;  %v180_v3 = vrot.slane %v160_v1, 4  ;;  %s208_s22 = scalar_lea.hbm %s617_s1, %s305_s15  ;;  %s150_s18 = scalar_lea.vmem [#allocation6], %s303_s13 }
  0x22   : > { %s210_s23 = sshll.u32 %s150_s18, 4  ;;  %s212_s24 = sshll.u32 %s208_s22, 4  ;;  %vm194_vm1 = vcmp.lt.s32.totalorder %v192_v12, 256  ;;  %s211_s23 = int_to_ptr.vmem [resolvable:$true] %s210_s23  ;;  %s213_s24 = int_to_ptr.hbm [resolvable:$true] %s212_s24 }
  0x23   : > { %v175_v4 = vadd.f32 %v174_v2, %v159_v0  ;;  %v181_v5 = vadd.f32 %v180_v3, %v160_v1  ;;  %s198_s9 = scalar_lea.sflag [#allocation5], %s569_s3  ;;  %s415_s25 = sshra.s32 %s213_s24, 4  ;;  %s416_s25 = int_to_ptr.hbm [resolvable:$true] %s415_s25 }
  0x24   : > { %s417_s26 = scalar_lea.hbm %s416_s25, 2  ;;  %s421_s29 = scalar_lea.hbm %s617_s1, 4 }
  0x25   : > { %v176_v6 = vrot.slane %v175_v4, 2  ;;  %v182_v7 = vrot.slane %v181_v5, 2  ;;  %p418_p4 = scmp.ne.s32.totalorder %s416_s25, %s417_s26  ;;  %p422_p7 = scmp.lt.s32.totalorder %s416_s25, %s617_s1 }
  0x26   : > { %p423_p8 = scmp.lt.s32.totalorder %s421_s29, %s417_s26 }
  0x27   : > { %v177_v8 = vadd.f32 %v176_v6, %v175_v4  ;;  %v183_v9 = vadd.f32 %v182_v7, %v181_v5  ;;  %p419_p5 = pnand %p418_p4, %p546_p9 }
  0x28   : > { %p424_p10 = por %p423_p8, %p422_p7 }
  0x29   : > { %v178_v10 = vrot.slane %v177_v8, 1  ;;  %v184_v11 = vrot.slane %v183_v9, 1  ;;  %p420_p6 = pneg %p419_p5 }
  0x2b   : > { %v179_v13 = vadd.f32 %v178_v10, %v177_v8  ;;  %v185_v14 = vadd.f32 %v184_v11, %v183_v9  ;;  %p425_p13 = pnand %p424_p10, %p420_p6 }
  0x2d   : > { %v188_v15 = vrot.slane %v185_v14, 7 }
  0x2f   : > { %v190_v16 = vsel %vm189_vm0, %v179_v13, %v188_v15 }
  0x30   : > { %196 = vst.msk [vmem:[%s150_s18] sm:$0x3] %vm194_vm1, %v190_v16 }
  0x31   : > { %428 = shalt.err (!%p425_p13)
}
  0x32   : > { %311 = dma.vmem_to_hbm [thread:$0]  (%p546_p9), %s211_s23, 32, %s213_s24, %s198_s9  }
  0x33 PF: > { %s224_s3 = sand.u32 1, %s463_s6   ;;  %p318_p0 = pnand %p297_p12, %p553_p11 }
  0x34   : > { %s225_s4 = scalar_lea.sflag [#allocation5], %s224_s3 }
  0x35   : > { %p319_p1 = pneg %p318_p0 }
  0x37   : > { %458 = dma.done.wait (%p319_p1), %s225_s4, 32  }
  0x38   : > { %460 = vsyncadd (%p319_p1), %s225_s4, 4294967264  ;;  %s17_s11 = sadd.s32 1, %s483_s11   ;;  %s622_s6 = smov %s467_s7 }
  0x39   : > { %p14_p2 = scmp.ge.s32.totalorder %s17_s11, 4   ;;  %s623_s7 = smov %s471_s8 }
  0x3a   : > { %s624_s8 = smov %s551_s20  ;;  %s625_s9 = smov %s479_s10 }
  0x3b   : > { %s626_s10 = smov %s628_s14  ;;  %16 = sbr.rel (!%p14_p2) target bundleno = 6 (0x6), region = 77 }
  0x40   :  { %231 = vsyncpa [#allocation4], 1 }
  0x41   :  { %233 = vsyncpa [#allocation4 + $0x1], 1 }
  0x42   :  { %234 = vsyncpa [#allocation5], 1 }
  0x43   :  { %236 = vsyncpa [#allocation5 + $0x1], 1 }

</bundles_post_ra>
